<compile_context>
chip_gen: v5e
topology: v5e:2x2
jax: 0.10.0
libtpu: 0.0.40
codegen_flags: <defaults>
</compile_context>

<pallas_src>
import functools

import jax
import jax.numpy as jnp
from jax import lax
from jax.experimental import pallas as pl
from jax.experimental.pallas import tpu as pltpu


def _round_up(x, m):
    return ((x + m - 1) // m) * m


# --------------------------------------------------------------------------- #
# Kernels
# --------------------------------------------------------------------------- #
def _glu_finalize(y, o_ref, cout, half):
    """y: (TL, 2*half) f32 (bias already added). Writes (cout, TL) to o_ref."""
    val = y[:, :half]
    gate = y[:, half:]
    # exp lands on the EUP; reciprocal (exact) keeps the divide off the VALU.
    glu = val * pl.reciprocal(1.0 + jnp.exp(-gate), approx=False)
    # (TL, half) -> (half, TL) on the XLU, then drop the padded channel rows.
    o_ref[...] = jnp.transpose(glu)[:cout, :].astype(o_ref.dtype)


def _downlay_kernel_single(p_ref, w_ref, b_ref, o_ref, *, cout, half):
    """Whole contraction resident: no accumulator scratch, direct finalize.

    p_ref: (TL, CK)        im2col patch tile (feature order (k, c))
    w_ref: (CK, 2*half)    packed [W_val | W_gate]
    b_ref: (1, 2*half)     packed bias (f32)
    o_ref: (cout, TL)      NCL output tile (batch dim squeezed)
    """
    y = jnp.dot(p_ref[...], w_ref[...], preferred_element_type=jnp.float32)
    _glu_finalize(y + b_ref[...], o_ref, cout, half)


def _downlay_kernel_multi(p_ref, w_ref, b_ref, o_ref, acc_ref, *, cout, half):
    """K-tiled contraction: f32 accumulator, last dot folded into finalize."""
    k = pl.program_id(2)
    nk = pl.num_programs(2)
    d = jnp.dot(p_ref[...], w_ref[...], preferred_element_type=jnp.float32)

    @pl.when(k == 0)
    def _():
        acc_ref[...] = d

    @pl.when(jnp.logical_and(k > 0, k < nk - 1))
    def _():
        acc_ref[...] = acc_ref[...] + d

    @pl.when(k == nk - 1)
    def _():
        # acc holds the sum over k = 0..nk-2; fold the final dot in directly
        # (no extra accumulator store + reload on the last step).
        _glu_finalize(acc_ref[...] + d + b_ref[...], o_ref, cout, half)


# --------------------------------------------------------------------------- #
# Tiling / VMEM budgeting
# --------------------------------------------------------------------------- #
@functools.lru_cache(maxsize=1)
def _vmem_budget():
    """(tile budget bytes, vmem_limit_bytes) from the TPU generation."""
    cap = 64 * 1024 * 1024                      # conservative fallback (v7x-safe)
    try:
        info = pltpu.get_tpu_info()
        c = getattr(info, "vmem_capacity_bytes", None)
        if c:
            cap = int(c)
    except Exception:
        pass
    cap = max(cap, 64 * 1024 * 1024)
    budget = (cap * 3) // 8                     # 48 MiB on 128 MiB parts, 24 MiB on v7x
    vmem_limit = min((cap * 5) // 8, 96 * 1024 * 1024)
    return int(budget), int(vmem_limit)


def _pick_tiles(n_batch, l_out, ck, w_tot, cout, in_bytes, out_bytes, budget,
                force_tk=None):
    """Pick (TL, TK): output-row tile and contraction tile, from a VMEM budget."""

    def wbytes(tk):  # double-buffered packed weight + bias tiles
        return 2 * tk * w_tot * in_bytes + 2 * w_tot * 4

    if force_tk is not None:
        tk = min(int(force_tk), ck)
        if tk < ck:
            tk = max(128, (tk // 128) * 128)
    elif ck <= 1024 or wbytes(ck) <= budget // 2:
        tk = ck                                  # whole contraction resident
    else:
        tk = 1024
        while tk > 256 and wbytes(tk) > budget // 2:
            tk //= 2

    # Per output row: double-buffered patch row + double-buffered output row
    # + f32 accumulator / dot result + headroom for GLU / transpose temporaries.
    per_row = 2 * tk * in_bytes + 2 * cout * out_bytes + w_tot * 4 + w_tot * 4
    avail = max(budget - wbytes(tk), per_row * 128)
    max_rows = max(128, min(avail // per_row, 1024))

    if l_out <= max_rows:
        tl = l_out
        if n_batch == 1 and l_out > 128:
            # v7x has two TensorCores; keep >= 2 tiles on the parallel axes.
            tl = min(l_out, _round_up(-(-l_out // 2), 128))
    else:
        tl = max(128, (max_rows // 128) * 128)   # multiple of 128 -> lane-dense out
    return int(tl), int(tk)


# --------------------------------------------------------------------------- #
# Forward wrapper
# --------------------------------------------------------------------------- #
def downlay_forward(x, weight, bias, *, downx=2, compute_dtype=None,
                    force_k_tile=None):
    """Pallas forward for downlay.

    x:      (N, indim, L)           NCL, like the PyTorch module
    weight: (2*outdim, indim, K)    PyTorch Conv1d layout (O, I, K), K = 2*downx
    bias:   (2*outdim,)
    compute_dtype: optional MXU operand dtype (e.g. jnp.bfloat16); accumulation,
                   bias and the GLU stay in f32.
    force_k_tile: testing hook to force contraction tiling.
    returns (N, outdim, L_out)      NCL
    """
    N, Cin, L = x.shape
    K = 2 * downx
    stride = downx
    pad = downx // 2
    Cout2 = weight.shape[0]
    Cout = Cout2 // 2
    L_out = (L + 2 * pad - K) // stride + 1
    CK = Cin * K

    in_dtype = jnp.dtype(compute_dtype) if compute_dtype is not None else x.dtype
    in_bytes = jnp.dtype(in_dtype).itemsize
    out_bytes = jnp.dtype(x.dtype).itemsize

    # GLU halves are packed [val | gate] so one matmul fills 2*half lanes of the
    # MXU; small outdim pads each half only to 64 (total width 128).
    half = 64 if Cout <= 64 else _round_up(Cout, 128)
    W_tot = 2 * half

    # ---- im2col patches (N, L_out, K*Cin), feature order (k, c) -------------
    # TODO(synk): fuse this im2col into the kernel so the ~2x-expanded patch
    # copy is never materialized in HBM.
    x_nlc = jnp.transpose(x, (0, 2, 1))                        # (N, L, Cin)
    x_nlc = jnp.pad(x_nlc, ((0, 0), (pad, pad), (0, 0)))       # (N, L_pad, Cin)
    cols = [
        x_nlc[:, k0: k0 + (L_out - 1) * stride + 1: stride, :]
        for k0 in range(K)
    ]
    patches = jnp.concatenate(cols, axis=-1).astype(in_dtype)  # (N, L_out, CK)

    # ---- weights: (O, I, K) -> (K*Cin, 2*Cout) -> packed (CK, 2*half) -------
    w_mat = jnp.transpose(weight, (2, 1, 0)).reshape(CK, Cout2)
    pc = half - Cout
    wcat = jnp.concatenate(
        [jnp.pad(w_mat[:, :Cout], ((0, 0), (0, pc))),
         jnp.pad(w_mat[:, Cout:], ((0, 0), (0, pc)))], axis=1).astype(in_dtype)
    bcat = jnp.concatenate(
        [jnp.pad(bias[:Cout], (0, pc)), jnp.pad(bias[Cout:], (0, pc))]
    ).astype(jnp.float32).reshape(1, W_tot)

    budget, vmem_limit = _vmem_budget()
    TL, TK = _pick_tiles(N, L_out, CK, W_tot, Cout, in_bytes, out_bytes, budget,
                         force_tk=force_k_tile)

    nl = pl.cdiv(L_out, TL)
    nk = pl.cdiv(CK, TK)
    Lp = nl * TL
    CKp = nk * TK
    # Pad the *inputs* so every block is full (keeps the contraction free of
    # garbage); the output edge block, if any, is masked by Pallas.
    if Lp != L_out or CKp != CK:
        patches = jnp.pad(patches, ((0, 0), (0, Lp - L_out), (0, CKp - CK)))
    if CKp != CK:
        wcat = jnp.pad(wcat, ((0, CKp - CK), (0, 0)))

    grid = (N, nl, nk)
    in_specs = [
        pl.BlockSpec((None, TL, TK), lambda n, l, k: (n, l, k)),   # patches tile
        pl.BlockSpec((TK, W_tot), lambda n, l, k: (k, 0)),         # packed weight
        pl.BlockSpec((1, W_tot), lambda n, l, k: (0, 0)),          # packed bias
    ]
    out_spec = pl.BlockSpec((None, Cout, TL), lambda n, l, k: (n, 0, l))

    if nk == 1:
        kernel = functools.partial(_downlay_kernel_single, cout=Cout, half=half)
        scratch = []
    else:
        kernel = functools.partial(_downlay_kernel_multi, cout=Cout, half=half)
        scratch = [pltpu.VMEM((TL, W_tot), jnp.float32)]

    return pl.pallas_call(
        kernel,
        out_shape=jax.ShapeDtypeStruct((N, Cout, L_out), x.dtype),
        grid_spec=pltpu.PrefetchScalarGridSpec(
            num_scalar_prefetch=0,
            grid=grid,
            in_specs=in_specs,
            out_specs=out_spec,
            scratch_shapes=scratch,
        ),
        compiler_params=pltpu.CompilerParams(
            dimension_semantics=("parallel", "parallel", "arbitrary"),
            vmem_limit_bytes=vmem_limit,
        ),
    )(patches, wcat, bcat)


# --------------------------------------------------------------------------- #
# Reference & self-test
# --------------------------------------------------------------------------- #
def _reference(x, weight, bias, *, downx=2):
    """Pure-JAX reference (lax conv + GLU)."""
    pad = downx // 2
    y = lax.conv_general_dilated(
        x, weight,
        window_strides=(downx,),
        padding=((pad, pad),),
        dimension_numbers=("NCH", "OIH", "NCH"),
    ) + bias[None, :, None]
    cout = weight.shape[0] // 2
    out, gate = y[:, :cout, :], y[:, cout:, :]
    return out * jax.nn.sigmoid(gate)


if __name__ == "__main__":
    downx = 2
    K = 2 * downx

    # --- small shape (module-consistent): N=2, indim=4, L=16, outdim=8 -------
    N, indim, L, outdim = 2, 4, 16, 8
    key = jax.random.PRNGKey(0)
    kx, kw, kb = jax.random.split(key, 3)
    x = jax.random.normal(kx, (N, indim, L), dtype=jnp.float32)
    fan_in = indim * K
    bound = 1.0 / (fan_in ** 0.5)
    weight = jax.random.uniform(kw, (2 * outdim, indim, K),
                                minval=-bound, maxval=bound, dtype=jnp.float32)
    bias = jax.random.uniform(kb, (2 * outdim,),
                              minval=-bound, maxval=bound, dtype=jnp.float32)

    y_ref = _reference(x, weight, bias, downx=downx)

    fwd_f32 = jax.jit(functools.partial(downlay_forward, downx=downx))
    y = fwd_f32(x, weight, bias)
    jax.block_until_ready(y)
    assert y.shape == (N, outdim, L // downx), y.shape
    assert jnp.allclose(y, y_ref, atol=1e-5, rtol=1e-5), "f32 mismatch vs reference"

    # bf16 MXU operands, f32 accumulation/GLU (loose check)
    fwd_bf16 = jax.jit(functools.partial(downlay_forward, downx=downx,
                                         compute_dtype=jnp.bfloat16))
    y_bf16 = fwd_bf16(x, weight, bias)
    jax.block_until_ready(y_bf16)
    assert jnp.allclose(y_bf16, y_ref, atol=5e-2, rtol=5e-2), "bf16 mismatch vs reference"

    # --- medium shape: exercises L tiling (TL=128), the N==1 two-tile split,
    # the outdim>64 (half=128) path, and (forced) the multi-K accumulator kernel.
    N2, indim2, L2, outdim2 = 1, 96, 512, 96
    kx2, kw2, kb2 = jax.random.split(jax.random.PRNGKey(1), 3)
    x2 = jax.random.normal(kx2, (N2, indim2, L2), dtype=jnp.float32)
    fan2 = indim2 * K
    b2 = 1.0 / (fan2 ** 0.5)
    w2 = jax.random.uniform(kw2, (2 * outdim2, indim2, K),
                            minval=-b2, maxval=b2, dtype=jnp.float32)
    bb2 = jax.random.uniform(kb2, (2 * outdim2,),
                             minval=-b2, maxval=b2, dtype=jnp.float32)
    y2_ref = _reference(x2, w2, bb2, downx=downx)

    y2 = jax.jit(functools.partial(downlay_forward, downx=downx))(x2, w2, bb2)
    jax.block_until_ready(y2)
    assert y2.shape == (N2, outdim2, L2 // downx), y2.shape
    assert jnp.allclose(y2, y2_ref, atol=2e-4, rtol=2e-4), "f32 medium mismatch"

    y3 = jax.jit(functools.partial(downlay_forward, downx=downx,
                                   force_k_tile=128))(x2, w2, bb2)
    jax.block_until_ready(y3)
    assert jnp.allclose(y3, y2_ref, atol=2e-4, rtol=2e-4), "multi-K-tile mismatch"

    print("KERNEL_OK")
</pallas_src>

<mosaic_0001>
module attributes {stable_mosaic.version = 11 : i64} {
  func.func @_downlay_kernel_single(%arg0: i32, %arg1: i32, %arg2: i32, %arg3: memref<1x8x16xf32, #tpu.memory_space<vmem>>, %arg4: memref<16x128xf32, #tpu.memory_space<vmem>>, %arg5: memref<1x128xf32, #tpu.memory_space<vmem>>, %arg6: memref<1x8x8xf32, #tpu.memory_space<vmem>>) attributes {dimension_semantics = [#tpu.dimension_semantics<parallel>, #tpu.dimension_semantics<parallel>, #tpu.dimension_semantics<arbitrary>], iteration_bounds = array<i64: 2, 1, 1>, scalar_prefetch = 0 : i64, scratch_operands = 0 : i64, tpu.core_type = #tpu.core_type<tc>, window_params = [{transform_indices = @transform_0, window_bounds = array<i64: 1, 8, 16>}, {transform_indices = @transform_1, window_bounds = array<i64: 16, 128>}, {pipeline_mode = #tpu.pipeline_mode<synchronous>, transform_indices = @transform_2, window_bounds = array<i64: 1, 128>}, {transform_indices = @transform_3, window_bounds = array<i64: 1, 8, 8>}]} {
    %c0 = arith.constant 0 : index
    %c0_0 = arith.constant 0 : index
    %c0_1 = arith.constant 0 : index
    %0 = vector.load %arg3[%c0, %c0_0, %c0_1] : memref<1x8x16xf32, #tpu.memory_space<vmem>>, vector<1x8x16xf32>
    %1 = vector.shape_cast %0 : vector<1x8x16xf32> to vector<8x16xf32>
    %c0_2 = arith.constant 0 : index
    %c0_3 = arith.constant 0 : index
    %2 = vector.load %arg4[%c0_2, %c0_3] : memref<16x128xf32, #tpu.memory_space<vmem>>, vector<16x128xf32>
    %cst = arith.constant dense<0.000000e+00> : vector<8x128xf32>
    %3 = tpu.matmul %1, %2, %cst {dimension_numbers = #tpu.dot_dimension_numbers<[1], [0], [0], [1], [0, 0, 1, 1], [], []>} : vector<8x16xf32>, vector<16x128xf32>, vector<8x128xf32> -> vector<8x128xf32>
    %c0_4 = arith.constant 0 : index
    %c0_5 = arith.constant 0 : index
    %4 = vector.load %arg5[%c0_4, %c0_5] : memref<1x128xf32, #tpu.memory_space<vmem>>, vector<1x128xf32>
    %5 = vector.broadcast %4 : vector<1x128xf32> to vector<8x128xf32>
    %6 = arith.addf %3, %5 : vector<8x128xf32>
    %7 = vector.extract_strided_slice %6 {offsets = [0, 0], sizes = [8, 64], strides = [1, 1]} : vector<8x128xf32> to vector<8x64xf32>
    %8 = vector.extract_strided_slice %6 {offsets = [0, 64], sizes = [8, 64], strides = [1, 1]} : vector<8x128xf32> to vector<8x64xf32>
    %cst_6 = arith.constant 0.000000e+00 : f32
    %9 = vector.broadcast %cst_6 : f32 to vector<8x64xf32>
    %10 = arith.subf %9, %8 : vector<8x64xf32>
    %11 = math.exp %10 : vector<8x64xf32>
    %cst_7 = arith.constant 1.000000e+00 : f32
    %12 = vector.broadcast %cst_7 : f32 to vector<8x64xf32>
    %13 = arith.addf %12, %11 : vector<8x64xf32>
    %14 = tpu.reciprocal %13 : vector<8x64xf32> -> vector<8x64xf32>
    %15 = arith.mulf %7, %14 : vector<8x64xf32>
    %16 = tpu.transpose %15, [1, 0] : vector<8x64xf32> -> vector<64x8xf32>
    %17 = vector.extract_strided_slice %16 {offsets = [0, 0], sizes = [8, 8], strides = [1, 1]} : vector<64x8xf32> to vector<8x8xf32>
    %c0_8 = arith.constant 0 : index
    %c0_9 = arith.constant 0 : index
    %c0_10 = arith.constant 0 : index
    %18 = vector.load %arg6[%c0_8, %c0_9, %c0_10] : memref<1x8x8xf32, #tpu.memory_space<vmem>>, vector<1x8x8xf32>
    %19 = vector.shape_cast %18 : vector<1x8x8xf32> to vector<8x8xf32>
    %20 = vector.shape_cast %17 : vector<8x8xf32> to vector<1x8x8xf32>
    tpu.vector_store %arg6[%c0_8, %c0_9, %c0_10], %20 {strides = array<i32>} : memref<1x8x8xf32, #tpu.memory_space<vmem>>, vector<1x8x8xf32>,
    return
  }
  func.func @transform_0(%arg0: i32, %arg1: i32, %arg2: i32) -> (i32, i32, i32) {
    %c0_i32 = arith.constant 0 : i32
    return %arg0, %arg1, %arg2 : i32, i32, i32
  }
  func.func @transform_1(%arg0: i32, %arg1: i32, %arg2: i32) -> (i32, i32) {
    %c0_i32 = arith.constant 0 : i32
    %c0_i32_0 = arith.constant 0 : i32
    return %arg2, %c0_i32 : i32, i32
  }
  func.func @transform_2(%arg0: i32, %arg1: i32, %arg2: i32) -> (i32, i32) {
    %c0_i32 = arith.constant 0 : i32
    %c0_i32_0 = arith.constant 0 : i32
    %c0_i32_1 = arith.constant 0 : i32
    return %c0_i32, %c0_i32_0 : i32, i32
  }
  func.func @transform_3(%arg0: i32, %arg1: i32, %arg2: i32) -> (i32, i32, i32) {
    %c0_i32 = arith.constant 0 : i32
    %c0_i32_0 = arith.constant 0 : i32
    return %arg0, %c0_i32, %arg1 : i32, i32, i32
  }
}

</mosaic_0001>

<bundles_post_ra>
// kernel: downlay_forward.1
= control target key start
LH: loop header
LB: loop body
LE: loop exit
PB: predicated region body
PF: predicated region fallthrough
CT: control target
= control target key end

     0   :  { %8 = vsyncpa [#allocation3], 0  ;;  %s710_s0 = inlined_call_operand.vmem [shape: f32[2,8,16], index: 0, kind: input, shape index: {}]   ;;  %s711_s1 = inlined_call_operand.vmem [shape: f32[16,128], index: 1, kind: input, shape index: {}]   ;;  %s712_s2 = inlined_call_operand.vmem [shape: f32[1,128], index: 2, kind: input, shape index: {}]   ;;  %s713_s3 = inlined_call_operand.hbm [shape: f32[2,8,8], index: 3, kind: output, shape index: {}]  }
   0x1   :  { %10 = vsyncpa [#allocation3 + $0x1], 0  ;;  %s604_s12 = smov 0   ;;  %s606_s13 = smov 0  }
   0x2   :  { %s608_s14 = smov 0   ;;  %s610_s15 = smov 0  }
   0x3   :  { %s612_s16 = smov 0   ;;  %s614_s17 = smov 0  }
   0x4 LB: > { %s428_s18 = sadd.s32 4294967295, %s581_s17   ;;  %s429_s19 = sadd.s32 4294967294, %s581_s17   ;;  %s581_s17 = sphi %s614_s17, %s16_s17   ;;  %s577_s16 = sphi %s612_s16, %s720_s16   ;;  %s573_s15 = sphi %s610_s15, %s719_s15   ;;  %s569_s14 = sphi %s608_s14, %s718_s14   ;;  %s565_s13 = sphi %s606_s13, %s717_s13   ;;  %s561_s12 = sphi %s604_s12, %s716_s12  }
   0x5   : > { %s35_s20 = sadd.s32 1, %s577_s16  ;;  %s121_s21 = sadd.s32 1, %s569_s14 }
   0x6   : > { %p37_p0 = scmp.ge.s32.totalorder %s35_s20, 2  ;;  %p131_p1 = scmp.ne.s32.totalorder %s569_s14, %s565_s13 }
   0x7   : > { %p132_p2 = scmp.eq.s32.totalorder %s428_s18, 1  ;;  %p137_p3 = scmp.ne.s32.totalorder %s565_s13, %s561_s12 }
   0x8   : > { %s722_s20 = smov (%p37_p0, %s35_s20), 0  ;;  %p138_p5 = scmp.eq.s32.totalorder %s429_s19, 1 }
   0x9   : > { %p644_p4 = por %p132_p2, %p131_p1  ;;  %s116_s23 = ssub.s32 %s577_s16, %s722_s20 }
   0xa   : > { %p433_p6 = scmp.ge.s32.totalorder %s581_s17, 1  ;;  %p119_p7 = scmp.eq.s32.totalorder %s116_s23, 0 }
   0xb   : > { %p651_p8 = por %p138_p5, %p137_p3  ;;  %p181_p9 = scmp.lt.s32.totalorder %s581_s17, 3 }
   0xc   : > { %s657_s25 = scalar_select %p119_p7, %s569_s14, %s121_s21  }
   0xd   : > { %p182_p10 = pnand %p433_p6, %p181_p9 }
   0xe   : > { %p215_p11 = scmp.lt.s32.totalorder (!%p182_p10), %s573_s15, 1  ;;  %s583_s10 = smov (!%p182_p10), 64  }
   0xf   : > { %185 = sbr.rel (%p182_p10) target bundleno = 468 (0x1d4), region = 32  ;;  %s212_s11 = sand.u32 (!%p182_p10), 1, %s565_s13  }
  0x10   : > { %s434_s18 = sshll.u32 (!%p182_p10), %s212_s11, 3  ;;  %s438_s19 = sshll.u32 (!%p182_p10), %s573_s15, 3 }
  0x11   : > { %s331_s26 = scalar_lea.hbm (!%p182_p10), %s713_s3, %s438_s19  ;;  %s214_s27 = scalar_lea.vmem (!%p182_p10), [#allocation2], %s434_s18 }
  0x12   : > { %s333_s28 = sshll.u32 (!%p182_p10), %s214_s27, 4  ;;  %s335_s29 = sshll.u32 (!%p182_p10), %s331_s26, 4  ;;  %s334_s28 = int_to_ptr.vmem [resolvable:$true] %s333_s28  ;;  %s336_s29 = int_to_ptr.hbm [resolvable:$true] %s335_s29 }
  0x14   : > { %v233_v0 = vld [vmem:[%s711_s1 + $0x8] sm:$0xff]  ;;  %v232_v1 = vld [vmem:[%s711_s1] sm:$0xff]  ;;  %s216_s30 = scalar_select %p215_p11, %s573_s15, 1  ;;  %vm238_vm0 = vcmask 130048   ;;  %vm317_vm5 = vcmask 64512  }
  0x15   : > { %256 = vmatpush.msra.mxu0 %v233_v0  ;;  %v498_v3 = vld [vmem:[%s712_s2] ss:$0 sm:$0xff] }
  0x16   : > { %s435_s4 = sshll.u32 %s216_s30, 3  ;;  %s320_s30 = scalar_lea.sflag [#allocation3], %s212_s11 }
  0x17   : > { %257 = vmatpush.msra.mxu0 %v232_v1  ;;  %s224_s7 = scalar_lea.vmem %s710_s0, %s435_s4  ;;  %s517_s4 = sshra.s32 %s336_s29, 4  ;;  %s518_s4 = int_to_ptr.hbm [resolvable:$true] %s517_s4 }
  0x18   : > { %v231_v2 = vld [vmem:[%s224_s7] sm:$0xff]  ;;  %s519_s5 = scalar_lea.hbm %s518_s4, 8  ;;  %s523_s7 = scalar_lea.hbm %s713_s3, 16 }
  0x19   : > { %436 = vmatmul.msk.f32.vlgmr.msra.gmra.mxu0 %vm238_vm0, %v231_v2  ;;  %p520_p12 = scmp.ne.s32.totalorder %s518_s4, %s519_s5  ;;  %p524_p1 = scmp.lt.s32.totalorder %s518_s4, %s713_s3 }
  0x1a   : > { %p525_p2 = scmp.lt.s32.totalorder %s523_s7, %s519_s5 }
  0x1b   : > { %p521_p13 = pnand %p520_p12, %p644_p4 }
  0x1c   : > { %p526_p3 = por %p525_p2, %p524_p1 }
  0x1d   : > { %p522_p0 = pneg %p521_p13 }
  0x1f   : > { %p527_p5 = pnand %p526_p3, %p522_p0 }
  0x96   : > { %v259_v4 = vpop.f32.mrf.mxu0 }
  0x97   : > { %v260_v5 = vadd.f32 %v498_v3, %v259_v4 }
  0x99   : > { %v262_v6 = vsub.f32 0.0, %v260_v5 }
  0x9b   : > { %v263_v7 = vmul.f32 1.442695, %v262_v6 }
  0x9d   : > { %499 = vpow2.f32 %v263_v7 }
  0xa3   : > { %v500_v8 = vpop.eup %499 }
  0xa4   : > { %v265_v9 = vadd.f32 1.0, %v500_v8 }
  0xa6   : > { %501 = vrcp.f32 %v265_v9  ;;  %v277_v13 = vand.u32 2147483648, %v265_v9  ;;  %v275_v15 = vand.u32 2147483647, %v265_v9  ;;  %vm271_vm2 = vweird.f32 %v265_v9 }
  0xa8   : > { %v278_v17 = vor.u32 1.1754944e-38, %v277_v13  ;;  %vm276_vm4 = vcmp.eq.f32.partialorder %v275_v15, 8.507059e+37 }
  0xac   : > { %v502_v10 = vpop.eup %501 }
  0xad   : > { %v267_v11 = vmul.f32 %v502_v10, %v265_v9  ;;  %vm272_vm1 = vweird.f32 %v502_v10 }
  0xae   : > { %vm273_vm3 = vmor %vm271_vm2, %vm272_vm1 }
  0xaf   : > { %v268_v12 = vsub.f32 1.0, %v267_v11 }
  0xb1   : > { %v269_v14 = vmul.f32 %v502_v10, %v268_v12 }
  0xb3   : > { %v270_v16 = vadd.f32 %v502_v10, %v269_v14 }
  0xb5   : > { %v274_v18 = vsel %vm273_vm3, %v502_v10, %v270_v16 }
  0xb6   : > { %v279_v19 = vsel %vm276_vm4, %v278_v17, %v274_v18 }
  0xb7   : > { %281 = vrot.lane.b32.xlu0 %v279_v19, %s583_s10 }
 0x129   : > { %v282_v20 = vpop.permute.xlu0 %281 }
 0x12a   : > { %v284_v21 = vmul.f32 %v282_v20, %v260_v5 }
 0x12c   : > { %285 = vxpose.xlu0.b32.start.end [1/1] (short) (narrow) %v284_v21, 8 }
 0x1d0   : > { %v301_v22 = vpop.trf.xlu0 }
 0x1d1   : > { %318 = vst.msk [vmem:[%s214_s27] sm:$0xff] %vm317_vm5, %v301_v22 }
 0x1d2   : > { %530 = shalt.err (!%p527_p5)
}
 0x1d3   : > { %441 = dma.vmem_to_hbm [thread:$0]  (%p644_p4), %s334_s28, 128, %s336_s29, %s320_s30  }
 0x1d4 PF: > { %p447_p6 = scmp.ge.s32.totalorder %s581_s17, 2  ;;  %s347_s10 = sand.u32 1, %s561_s12  }
 0x1d5   : > { %s348_s11 = scalar_lea.sflag [#allocation3], %s347_s10 }
 0x1d6   : > { %p444_p7 = pnand %p447_p6, %p651_p8 }
 0x1d8   : > { %p445_p9 = pneg %p444_p7 }
 0x1da   : > { %556 = dma.done.wait (%p445_p9), %s348_s11, 128  }
 0x1db   : > { %558 = vsyncadd (%p445_p9), %s348_s11, 4294967168  ;;  %s16_s17 = sadd.s32 1, %s581_s17   ;;  %s716_s12 = smov %s565_s13 }
 0x1dc   : > { %p13_p10 = scmp.ge.s32.totalorder %s16_s17, 4   ;;  %s717_s13 = smov %s569_s14 }
 0x1dd   : > { %s718_s14 = smov %s657_s25  ;;  %s719_s15 = smov %s577_s16 }
 0x1de   : > { %s720_s16 = smov %s722_s20  ;;  %15 = sbr.rel (!%p13_p10) target bundleno = 4 (0x4), region = 70 }
 0x1e3   :  { %354 = vsyncpa [#allocation3], 1 }
 0x1e4   :  { %356 = vsyncpa [#allocation3 + $0x1], 1 }

</bundles_post_ra>
